<compile_context>
chip_gen: v6e
topology: v6e:2x2x1
jax: 0.10.0
libtpu: 0.0.40
codegen_flags: <defaults>
</compile_context>

<pallas_src>
import math
import functools

import jax
import jax.numpy as jnp
from jax.experimental import pallas as pl
from jax.experimental.pallas import tpu as pltpu

MAX_LEN = 20000


def _posenc_kernel(seed_ref, x_ref, pe_ref, o_ref, *, p, training, block_rows):
    # seed_ref: (1,) int32 scalar-prefetch (SMEM)
    # x_ref   : (TS, B, D) tile in VMEM
    # pe_ref  : (TS, D)    tile in VMEM (broadcast over batch inside the kernel)
    x = x_ref[...]
    pe = pe_ref[...].astype(x.dtype)
    y = x + pe[:, None, :]

    if training and p > 0.0:
        shape = y.shape  # (TS, B, D)
        ts, b, d = shape
        # Global element index (seq offset of this tile folded in) -> mask is
        # unique per tile and independent of the tiling.
        row0 = pl.program_id(0) * block_rows
        s_idx = jax.lax.broadcasted_iota(jnp.int32, shape, 0) + row0
        b_idx = jax.lax.broadcasted_iota(jnp.int32, shape, 1)
        d_idx = jax.lax.broadcasted_iota(jnp.int32, shape, 2)
        idx = (s_idx * b + b_idx) * d + d_idx

        # Counter-based hash (murmur3-style finalizer) of (index, seed).
        h = idx.astype(jnp.uint32) * jnp.uint32(0x9E3779B1)
        h = h + seed_ref[0].astype(jnp.uint32)
        h = h ^ (h >> 16)
        h = h * jnp.uint32(0x85EBCA6B)
        h = h ^ (h >> 13)
        h = h * jnp.uint32(0xC2B2AE35)
        h = h ^ (h >> 16)

        # Top 24 bits as a non-negative int32 uniform in [0, 2^24); integer
        # threshold compare (no float conversion on the dropout path).
        u24 = (h >> 8).astype(jnp.int32)
        thresh = jnp.int32(int(p * (1 << 24)))
        keep = u24 >= thresh  # keep with prob (1 - p)

        scale = jnp.asarray(1.0 / (1.0 - p), dtype=y.dtype)
        y = jnp.where(keep, y * scale, jnp.zeros_like(y))

    o_ref[...] = y.astype(o_ref.dtype)


def make_positional_encoding_table(d_model: int, max_len: int = MAX_LEN) -> jnp.ndarray:
    """pe table of shape (max_len, d_model); same math as the torch module
    (the torch buffer is (max_len, 1, d_model); the size-1 axis is dropped here
    and re-broadcast inside the kernel)."""
    position = jnp.arange(max_len, dtype=jnp.float32)[:, None]           # (max_len, 1)
    div_term = jnp.exp(
        jnp.arange(0, d_model, 2, dtype=jnp.float32) * (-math.log(10000.0) / d_model)
    )                                                                     # (d_model//2,)
    pe = jnp.zeros((max_len, d_model), dtype=jnp.float32)
    pe = pe.at[:, 0::2].set(jnp.sin(position * div_term))
    pe = pe.at[:, 1::2].set(jnp.cos(position * div_term))
    return pe


def _choose_block_rows(S, B, D, itemsize, target_bytes=2 * 1024 * 1024):
    """Seq-rows per tile: ~2 MiB per x tile, multiple of 8 (pe sublane dim)."""
    rows = max(1, target_bytes // max(1, B * D * itemsize))
    ts = min(int(rows), S)
    ts = max(8, ((ts + 7) // 8) * 8)
    return ts


def positional_encoding_forward(x, pe, *, dropout_p=0.1, training=True, seed=0):
    """x: (seq_len, batch, d_model); pe: (max_len, d_model) float32."""
    S, B, D = x.shape
    max_len, d_model = pe.shape
    assert S <= max_len and D == d_model

    itemsize = jnp.dtype(x.dtype).itemsize
    ts = _choose_block_rows(S, B, D, itemsize)
    grid = (pl.cdiv(S, ts),)

    kernel = functools.partial(
        _posenc_kernel, p=float(dropout_p), training=bool(training), block_rows=ts
    )
    seed_arr = jnp.asarray([seed], dtype=jnp.int32)

    return pl.pallas_call(
        kernel,
        out_shape=jax.ShapeDtypeStruct((S, B, D), x.dtype),
        grid_spec=pltpu.PrefetchScalarGridSpec(
            num_scalar_prefetch=1,          # seed -> SMEM, passed to index_maps
            grid=grid,
            in_specs=[
                pl.BlockSpec((ts, B, D), lambda i, seed: (i, 0, 0)),  # x tile
                pl.BlockSpec((ts, D), lambda i, seed: (i, 0)),        # pe rows (no pe[:S] copy)
            ],
            out_specs=pl.BlockSpec((ts, B, D), lambda i, seed: (i, 0, 0)),
        ),
        compiler_params=pltpu.CompilerParams(
            dimension_semantics=("parallel",),       # shard seq tiles across TCs (v7x)
            vmem_limit_bytes=32 * 1024 * 1024,       # explicit; tiles sized well under this
        ),
    )(seed_arr, x, pe)


if __name__ == "__main__":
    seq_len, batch, d_model = 8, 2, 32

    key = jax.random.PRNGKey(0)
    x = jax.random.normal(key, (seq_len, batch, d_model), dtype=jnp.float32)

    pe = make_positional_encoding_table(d_model, MAX_LEN)
    ref = x + pe[:seq_len][:, None, :]

    # Eval mode (dropout is identity) -> must match x + pe[:seq_len] exactly.
    y_eval = positional_encoding_forward(x, pe, dropout_p=0.1, training=False)
    y_eval = jax.block_until_ready(y_eval)
    assert y_eval.shape == (seq_len, batch, d_model)
    assert jnp.allclose(y_eval, ref, atol=1e-6), "eval-mode mismatch vs reference"

    # Training mode (dropout active, p=0.1) -> exercise the in-kernel mask path.
    # TODO(synk): dropout RNG stream differs from torch.nn.Dropout (semantics match).
    y_train = positional_encoding_forward(x, pe, dropout_p=0.1, training=True, seed=1234)
    y_train = jax.block_until_ready(y_train)
    assert y_train.shape == (seq_len, batch, d_model)
    scaled = ref / (1.0 - 0.1)
    ok = jnp.logical_or(jnp.isclose(y_train, scaled, atol=1e-5), y_train == 0.0)
    assert bool(jnp.all(ok)), "training-mode dropout semantics mismatch"

    print("KERNEL_OK")
</pallas_src>

<mosaic_0001>
module attributes {stable_mosaic.version = 11 : i64} {
  func.func @_posenc_kernel(%arg0: i32, %arg1: memref<1xi32, #tpu.memory_space<smem>>, %arg2: memref<8x2x32xf32, #tpu.memory_space<vmem>>, %arg3: memref<8x32xf32, #tpu.memory_space<vmem>>, %arg4: memref<8x2x32xf32, #tpu.memory_space<vmem>>) attributes {dimension_semantics = [#tpu.dimension_semantics<parallel>], iteration_bounds = array<i64: 1>, scalar_prefetch = 1 : i64, scratch_operands = 0 : i64, tpu.core_type = #tpu.core_type<tc>, window_params = [{transform_indices = @transform_0, window_bounds = array<i64: 8, 2, 32>}, {transform_indices = @transform_1, window_bounds = array<i64: 8, 32>}, {transform_indices = @transform_2, window_bounds = array<i64: 8, 2, 32>}]} {
    %c0 = arith.constant 0 : index
    %c0_0 = arith.constant 0 : index
    %c0_1 = arith.constant 0 : index
    %0 = vector.load %arg2[%c0, %c0_0, %c0_1] : memref<8x2x32xf32, #tpu.memory_space<vmem>>, vector<8x2x32xf32>
    %c0_2 = arith.constant 0 : index
    %c0_3 = arith.constant 0 : index
    %1 = vector.load %arg3[%c0_2, %c0_3] : memref<8x32xf32, #tpu.memory_space<vmem>>, vector<8x32xf32>
    %2 = vector.shape_cast %1 : vector<8x32xf32> to vector<8x1x32xf32>
    %3 = vector.broadcast %2 : vector<8x1x32xf32> to vector<8x2x32xf32>
    %4 = arith.addf %0, %3 : vector<8x2x32xf32>
    %c0_4 = arith.constant 0 : index
    %c0_5 = arith.constant 0 : index
    %c0_6 = arith.constant 0 : index
    %5 = vector.load %arg4[%c0_4, %c0_5, %c0_6] : memref<8x2x32xf32, #tpu.memory_space<vmem>>, vector<8x2x32xf32>
    tpu.vector_store %arg4[%c0_4, %c0_5, %c0_6], %4 {strides = array<i32>} : memref<8x2x32xf32, #tpu.memory_space<vmem>>, vector<8x2x32xf32>,
    return
  }
  func.func @transform_0(%arg0: i32, %arg1: memref<1xi32, #tpu.memory_space<smem>>) -> (i32, i32, i32) {
    %c0_i32 = arith.constant 0 : i32
    %c0_i32_0 = arith.constant 0 : i32
    %c0_i32_1 = arith.constant 0 : i32
    return %arg0, %c0_i32, %c0_i32_0 : i32, i32, i32
  }
  func.func @transform_1(%arg0: i32, %arg1: memref<1xi32, #tpu.memory_space<smem>>) -> (i32, i32) {
    %c0_i32 = arith.constant 0 : i32
    %c0_i32_0 = arith.constant 0 : i32
    return %arg0, %c0_i32 : i32, i32
  }
  func.func @transform_2(%arg0: i32, %arg1: memref<1xi32, #tpu.memory_space<smem>>) -> (i32, i32, i32) {
    %c0_i32 = arith.constant 0 : i32
    %c0_i32_0 = arith.constant 0 : i32
    %c0_i32_1 = arith.constant 0 : i32
    return %arg0, %c0_i32, %c0_i32_0 : i32, i32, i32
  }
}

</mosaic_0001>

<bundles_post_ra>
// kernel: tpu_custom_call.1
= control target key start
LH: loop header
LB: loop body
LE: loop exit
PB: predicated region body
PF: predicated region fallthrough
CT: control target
= control target key end

     0   :  { %v28_v1 = vlaneseq  ;;  %v172_v2 = vmov 1966171168   ;;  %s234_s0 = inlined_call_operand.<no memory space> [shape: s32[1], index: 0, kind: input, shape index: {}]   ;;  %s235_s1 = inlined_call_operand.vmem [shape: f32[8,2,32], index: 1, kind: input, shape index: {}]   ;;  %s236_s2 = inlined_call_operand.vmem [shape: f32[20000,32], index: 2, kind: input, shape index: {}]   ;;  %s237_s3 = inlined_call_operand.hbm [shape: f32[8,2,32], index: 3, kind: output, shape index: {}]  }
   0x1   :  { %v22_v0 = vld [vmem:[%s236_s2] sm:$0xff]  ;;  %v26_v3 = vunpack.c.l.s4 %v172_v2 }
   0x2   :  { %v29_v4 = vshrl.u32 %v28_v1, 7  ;;  %v24_v6 = vcombine.high %v22_v0, %v22_v0 }
   0x3   :  { %v27_v5 = vunpack.c.0.s8 %v26_v3 }
   0x4   :  { %9 = vsyncpa [#allocation5], 0  ;;  %v75_v9 = vsub.s32 0, %v29_v4  ;;  %v14_v15 = vld [vmem:[%s235_s1] sm:$0x3]  ;;  %vm121_vm0 = vcmask 254976  }
   0x5   :  { %v30_v7 = vsub.s32 %v27_v5, %v29_v4  ;;  %v18_v19 = vld [vmem:[%s235_s1 + $0x8] sm:$0x3]  ;;  %v15_v21 = vld [vmem:[%s235_s1 + $0x2] sm:$0x3]  ;;  %v16_v22 = vld [vmem:[%s235_s1 + $0x4] sm:$0x3] }
   0x6   :  { %v19_v29 = vld [vmem:[%s235_s1 + $0xa] sm:$0x3]  ;;  %v20_v30 = vld [vmem:[%s235_s1 + $0xc] sm:$0x3]  ;;  %v17_v31 = vld [vmem:[%s235_s1 + $0x6] sm:$0x3] }
   0x7   :  { %v31_v8 = vrot.slane %v22_v0, %v30_v7  ;;  %v38_v10 = vrot.slane %v24_v6, %v30_v7  ;;  %v21_v39 = vld [vmem:[%s235_s1 + $0xe] sm:$0x3]  ;;  %s173_s28 = smov [#allocation4]  }
   0x8   :  { %s135_s29 = sshll.u32 %s173_s28, 4  ;;  %s136_s29 = int_to_ptr.vmem [resolvable:$true] %s135_s29 }
   0x9   :  { %v47_v11 = vrot.slane %v31_v8, %v30_v7  ;;  %v39_v12 = vcombine.high %v31_v8, %v31_v8  ;;  %v54_v13 = vrot.slane %v38_v10, %v30_v7  ;;  %v40_v14 = vcombine.high %v38_v10, %v38_v10  ;;  %s150_s1 = scalar_lea.vmem %s136_s29, 256  ;;  %p155_p1 = scmp.lt.s32.totalorder %s136_s29, %s136_s29 }
   0xa   :  { %p151_p0 = scmp.ne.s32.totalorder %s136_s29, %s150_s1  ;;  %p156_p2 = scmp.lt.s32.totalorder %s150_s1, %s150_s1 }
   0xb   :  { %v76_v16 = vrot.slane %v47_v11, %v75_v9  ;;  %v61_v17 = vrot.slane %v39_v12, %v30_v7  ;;  %v69_v18 = vcombine.high %v47_v11, %v47_v11  ;;  %v92_v20 = vrot.slane %v54_v13, %v75_v9 }
   0xc   :  { %v68_v23 = vrot.slane %v40_v14, %v30_v7  ;;  %v70_v24 = vcombine.high %v54_v13, %v54_v13  ;;  %p157_p3 = por %p156_p2, %p155_p1 }
   0xd   :  { %v113_v25 = vadd.f32 %v76_v16, %v14_v15  ;;  %v80_v26 = vrot.slane %v61_v17, %v75_v9  ;;  %v84_v27 = vrot.slane %v69_v18, %v75_v9  ;;  %v71_v28 = vcombine.high %v61_v17, %v61_v17 }
   0xe   :  { %v117_v32 = vadd.f32 %v92_v20, %v18_v19  ;;  %v96_v33 = vrot.slane %v68_v23, %v75_v9  ;;  %v100_v34 = vrot.slane %v70_v24, %v75_v9  ;;  %v72_v35 = vcombine.high %v68_v23, %v68_v23  ;;  %p158_p4 = pnand %p157_p3, %p151_p0 }
   0xf   :  { %122 = vst.msk [vmem:[#allocation4] sm:$0x3] %vm121_vm0, %v113_v25  ;;  %v114_v36 = vadd.f32 %v80_v26, %v15_v21  ;;  %v115_v37 = vadd.f32 %v84_v27, %v16_v22  ;;  %v88_v38 = vrot.slane %v71_v28, %v75_v9 }
  0x10   :  { %126 = vst.msk [vmem:[#allocation4 + $0x8] sm:$0x3] %vm121_vm0, %v117_v32  ;;  %v118_v40 = vadd.f32 %v96_v33, %v19_v29  ;;  %v119_v41 = vadd.f32 %v100_v34, %v20_v30  ;;  %v104_v42 = vrot.slane %v72_v35, %v75_v9 }
  0x11   :  { %123 = vst.msk [vmem:[#allocation4 + $0x2] sm:$0x3] %vm121_vm0, %v114_v36  ;;  %124 = vst.msk [vmem:[#allocation4 + $0x4] sm:$0x3] %vm121_vm0, %v115_v37  ;;  %v116_v43 = vadd.f32 %v88_v38, %v17_v31 }
  0x12   :  { %127 = vst.msk [vmem:[#allocation4 + $0xa] sm:$0x3] %vm121_vm0, %v118_v40  ;;  %128 = vst.msk [vmem:[#allocation4 + $0xc] sm:$0x3] %vm121_vm0, %v119_v41  ;;  %v120_v44 = vadd.f32 %v104_v42, %v21_v39 }
  0x13   :  { %125 = vst.msk [vmem:[#allocation4 + $0x6] sm:$0x3] %vm121_vm0, %v116_v43 }
  0x14   :  { %129 = vst.msk [vmem:[#allocation4 + $0xe] sm:$0x3] %vm121_vm0, %v120_v44 }
  0x15   :  { %161 = shalt.err (!%p158_p4)
}
  0x16   :  { %s174_s30 = smov 32   ;;  %s175_s4 = smov 2  }
  0x17   :  { %141 = dma.vmem_to_hbm [thread:$0]  %s136_s29, 256, %s237_s3, [#allocation5], %s174_s30, %s174_s30, %s175_s4  }
  0x18   :  { %170 = dma.done.wait [#allocation5], 256  }
  0x19   :  { %171 = vsyncadd [#allocation5], 4294967040 }
  0x1a   :  { %145 = vsyncpa [#allocation5], 1 }

</bundles_post_ra>
